<compile_context>
chip_gen: v5e
topology: v5e:2x2
jax: 0.10.0
libtpu: 0.0.40
codegen_flags: <defaults>
</compile_context>

<pallas_src>
import numpy as np
import jax
import jax.numpy as jnp
from jax.experimental import pallas as pl
from jax.experimental.pallas import tpu as pltpu


def _select_copy_kernel(x_ref, o_ref):
    # x_ref: (1, 1, TILE_M, N) -- the selected slice's tile
    # o_ref: (1, TILE_M, N)
    o_ref[...] = x_ref[0]


def _factor_trailing(trailing):
    """Factor prod(trailing) into (m, n) with a lane-dense n when possible."""
    r = 1
    for d in trailing:
        r *= int(d)
    for n in (2048, 1024, 512, 256, 128):   # prefer large multiple-of-128 lanes
        if r % n == 0:
            return r // n, n
    n = int(trailing[-1])                    # fall back to original last dim
    return r // n, n


def _choose_tile_rows(m, n, itemsize, max_bytes=2 * 1024 * 1024):
    """Largest sublane-aligned row tile whose bytes stay under max_bytes."""
    if m * n * itemsize <= max_bytes:
        return int(m)                        # full extent -> always legal
    t = (max_bytes // (n * itemsize)) // 8 * 8
    return int(max(8, min(t, m)))


def select_element(x, index):
    """Pallas equivalent of SelectElement.forward: returns x[:, index, ...]."""
    assert x.ndim >= 3
    B, S = x.shape[0], x.shape[1]
    trailing = tuple(x.shape[2:])
    idx = int(index) % S                     # normalize negative indices (PyTorch semantics)

    m, n = _factor_trailing(trailing)
    itemsize = jnp.dtype(x.dtype).itemsize
    tile_m = _choose_tile_rows(m, n, itemsize)

    # Layout-preserving (free) reshape so the kernel sees a lane-dense slab.
    x4 = x.reshape(B, S, m, n)

    grid = (B, pl.cdiv(m, tile_m))
    out3 = pl.pallas_call(
        _select_copy_kernel,
        out_shape=jax.ShapeDtypeStruct((B, m, n), x.dtype),
        grid=grid,
        in_specs=[
            pl.BlockSpec((1, 1, tile_m, n), lambda b, mi: (b, idx, mi, 0)),
        ],
        out_specs=pl.BlockSpec((1, tile_m, n), lambda b, mi: (b, mi, 0)),
        compiler_params=pltpu.CompilerParams(
            dimension_semantics=("parallel", "parallel"),
        ),
    )(x4)
    return out3.reshape((B,) + trailing)


if __name__ == "__main__":
    key = jax.random.PRNGKey(0)

    # Example consistent with the module: x[:, index, ...] on a 4-D input.
    B, S, H, W = 2, 4, 16, 16
    index = 1
    x = jax.random.normal(key, (B, S, H, W), dtype=jnp.float32)

    out = select_element(x, index)
    out = jax.block_until_ready(out)

    ref = x[:, index, ...]
    assert out.shape == ref.shape and out.dtype == x.dtype
    np.testing.assert_array_equal(np.asarray(out), np.asarray(ref))

    # Also exercise a 3-D input (B, S, D) and a negative index.
    x3 = jax.random.normal(jax.random.PRNGKey(1), (2, 8, 32), dtype=jnp.bfloat16)
    out3 = jax.block_until_ready(select_element(x3, -2))
    np.testing.assert_array_equal(np.asarray(out3), np.asarray(x3[:, -2, ...]))

    print("KERNEL_OK")
</pallas_src>

<mosaic_0001>
module attributes {stable_mosaic.version = 11 : i64} {
  func.func @_select_copy_kernel(%arg0: i32, %arg1: i32, %arg2: memref<1x1x1x256xf32, #tpu.memory_space<vmem>>, %arg3: memref<1x1x256xf32, #tpu.memory_space<vmem>>) attributes {dimension_semantics = [#tpu.dimension_semantics<parallel>, #tpu.dimension_semantics<parallel>], iteration_bounds = array<i64: 2, 1>, scalar_prefetch = 0 : i64, scratch_operands = 0 : i64, tpu.core_type = #tpu.core_type<tc>, window_params = [{transform_indices = @transform_0, window_bounds = array<i64: 1, 1, 1, 256>}, {transform_indices = @transform_1, window_bounds = array<i64: 1, 1, 256>}]} {
    %c0 = arith.constant 0 : index
    %c0_0 = arith.constant 0 : index
    %c0_1 = arith.constant 0 : index
    %c0_2 = arith.constant 0 : index
    %0 = vector.load %arg2[%c0, %c0_0, %c0_1, %c0_2] : memref<1x1x1x256xf32, #tpu.memory_space<vmem>>, vector<1x1x1x256xf32>
    %1 = vector.shape_cast %0 : vector<1x1x1x256xf32> to vector<1x1x256xf32>
    %c0_3 = arith.constant 0 : index
    %c0_4 = arith.constant 0 : index
    %c0_5 = arith.constant 0 : index
    %2 = vector.load %arg3[%c0_3, %c0_4, %c0_5] : memref<1x1x256xf32, #tpu.memory_space<vmem>>, vector<1x1x256xf32>
    tpu.vector_store %arg3[%c0_3, %c0_4, %c0_5], %1 {strides = array<i32>} : memref<1x1x256xf32, #tpu.memory_space<vmem>>, vector<1x1x256xf32>,
    return
  }
  func.func @transform_0(%arg0: i32, %arg1: i32) -> (i32, i32, i32, i32) {
    %c1_i32 = arith.constant 1 : i32
    %c0_i32 = arith.constant 0 : i32
    %c0_i32_0 = arith.constant 0 : i32
    return %arg0, %c1_i32, %arg1, %c0_i32 : i32, i32, i32, i32
  }
  func.func @transform_1(%arg0: i32, %arg1: i32) -> (i32, i32, i32) {
    %c0_i32 = arith.constant 0 : i32
    %c0_i32_0 = arith.constant 0 : i32
    return %arg0, %arg1, %c0_i32 : i32, i32, i32
  }
}

</mosaic_0001>

<bundles_post_ra>
// kernel: tpu_custom_call.1
= control target key start
LH: loop header
LB: loop body
LE: loop exit
PB: predicated region body
PF: predicated region fallthrough
CT: control target
= control target key end

     0   :  { %6 = vsyncpa [#allocation3], 0  ;;  %s579_s0 = inlined_call_operand.hbm [shape: f32[2,4,1,256], index: 0, kind: input, shape index: {}]   ;;  %s580_s1 = inlined_call_operand.hbm [shape: f32[2,1,256], index: 1, kind: output, shape index: {}]  }
   0x1   :  { %8 = vsyncpa [#allocation3 + $0x1], 0 }
   0x2   :  { %9 = vsyncpa [#allocation4], 0 }
   0x3   :  { %11 = vsyncpa [#allocation4 + $0x1], 0  ;;  %s459_s6 = smov 0   ;;  %s461_s7 = smov 0  }
   0x4   :  { %s463_s8 = smov 0   ;;  %s465_s9 = smov 0  }
   0x5   :  { %s467_s10 = smov 0   ;;  %s469_s11 = smov 0  }
   0x6 LB: > { %s260_s12 = sadd.s32 4294967295, %s447_s11   ;;  %s261_s13 = sadd.s32 4294967294, %s447_s11   ;;  %s447_s11 = sphi %s469_s11, %s17_s11   ;;  %s443_s10 = sphi %s467_s10, %s589_s10   ;;  %s439_s9 = sphi %s465_s9, %s588_s9   ;;  %s435_s8 = sphi %s463_s8, %s587_s8   ;;  %s431_s7 = sphi %s461_s7, %s586_s7   ;;  %s427_s6 = sphi %s459_s6, %s585_s6  }
   0x7   : > { %s29_s14 = sadd.s32 1, %s443_s10  ;;  %s38_s15 = sadd.s32 1, %s435_s8 }
   0x8   : > { %p31_p0 = scmp.ge.s32.totalorder %s29_s14, 2  ;;  %p45_p1 = scmp.ne.s32.totalorder %s435_s8, %s431_s7 }
   0x9   : > { %p46_p2 = scmp.eq.s32.totalorder %s447_s11, 0  ;;  %p51_p3 = scmp.ne.s32.totalorder %s431_s7, %s427_s6 }
   0xa   : > { %s591_s14 = smov (%p31_p0, %s29_s14), 0  ;;  %p52_p5 = scmp.eq.s32.totalorder %s260_s12, 0 }
   0xb   : > { %p500_p4 = por %p46_p2, %p45_p1  ;;  %s33_s17 = ssub.s32 %s443_s10, %s591_s14 }
   0xc   : > { %p77_p6 = scmp.eq.s32.totalorder %s260_s12, 1  ;;  %p36_p7 = scmp.eq.s32.totalorder %s33_s17, 0 }
   0xd   : > { %p506_p8 = por %p52_p5, %p51_p3  ;;  %p83_p10 = scmp.eq.s32.totalorder %s261_s13, 1 }
   0xe   : > { %p510_p9 = por %p77_p6, %p45_p1  ;;  %p263_p12 = scmp.ge.s32.totalorder %s447_s11, 2 }
   0xf   : > { %s515_s20 = scalar_select %p36_p7, %s435_s8, %s38_s15  }
  0x10   : > { %p517_p11 = por %p83_p10, %p51_p3  ;;  %p285_p13 = scmp.lt.s32.totalorder %s447_s11, 2 }
  0x11   : > { %s103_s22 = sand.u32 1, %s435_s8   ;;  %s265_s24 = sshll.u32 %s443_s10, 3 }
  0x12   : > { %s264_s23 = sshll.u32 %s103_s22, 1  ;;  %s207_s27 = scalar_lea.hbm %s579_s0, %s265_s24 }
  0x13   : > { %s107_s28 = scalar_lea.vmem [#allocation2], %s264_s23  ;;  %s208_s30 = scalar_lea.hbm %s207_s27, 2 }
  0x14   : > { %s118_s29 = sshll.u32 %s107_s28, 4  ;;  %s116_s2 = sshll.u32 %s208_s30, 4  ;;  %s119_s29 = int_to_ptr.vmem [resolvable:$true] %s118_s29  ;;  %s117_s2 = int_to_ptr.hbm [resolvable:$true] %s116_s2 }
  0x15   : > { %p278_p0 = pnand %p285_p13, %p500_p4  ;;  %p266_p1 = scmp.ge.s32.totalorder %s447_s11, 1 }
  0x16   : > { %p123_p2 = scmp.lt.s32.totalorder %s447_s11, 3  ;;  %s104_s3 = scalar_lea.sflag [#allocation3], %s103_s22 }
  0x17   : > { %280 = dma.hbm_to_vmem [thread:$0]  (!%p278_p0), %s117_s2, 32, %s119_s29, %s104_s3  }
  0x18   : > { %p124_p3 = pnand %p266_p1, %p123_p2 }
  0x19   : > { %s533_s4 = sand.u32 (!%p124_p3), 1, %s431_s7  }
  0x1a   : > { %127 = sbr.rel (%p124_p3) target bundleno = 47 (0x2f), region = 24  ;;  %s267_s5 = sshll.u32 (!%p124_p3), %s533_s4, 1 }
  0x1b   : > { %s130_s12 = scalar_lea.sflag (!%p124_p3), [#allocation3], %s533_s4  ;;  %s133_s13 = scalar_lea.vmem (!%p124_p3), [#allocation2], %s267_s5 }
  0x1f   : > { %418 = dma.done.wait (%p506_p8), %s130_s12, 32  }
  0x20   : > { %420 = vsyncadd (%p506_p8), %s130_s12, 4294967264  ;;  %v154_v0 = vlaneseq  ;;  %s270_s15 = sshll.u32 %s439_s9, 1  ;;  %s152_s23 = scalar_lea.vmem [#allocation5], %s267_s5  ;;  %v153_v1 = vld [vmem:[%s133_s13] sm:$0x3] }
  0x21   : > { %s172_s22 = scalar_lea.hbm %s580_s1, %s270_s15  ;;  %s174_s24 = sshll.u32 %s152_s23, 4  ;;  %s175_s24 = int_to_ptr.vmem [resolvable:$true] %s174_s24 }
  0x22   : > { %s176_s25 = sshll.u32 %s172_s22, 4  ;;  %vm156_vm0 = vcmp.lt.s32.totalorder %v154_v0, 256  ;;  %s160_s26 = scalar_lea.sflag [#allocation4], %s533_s4  ;;  %s177_s25 = int_to_ptr.hbm [resolvable:$true] %s176_s25 }
  0x23   : > { %158 = vst.msk [vmem:[%s152_s23] sm:$0x3] %vm156_vm0, %v153_v1  ;;  %s379_s18 = sshra.s32 %s177_s25, 4  ;;  %s385_s29 = scalar_lea.hbm %s580_s1, 4  ;;  %s380_s18 = int_to_ptr.hbm [resolvable:$true] %s379_s18 }
  0x24   : > { %s381_s27 = scalar_lea.hbm %s380_s18, 2  ;;  %p386_p7 = scmp.lt.s32.totalorder %s380_s18, %s580_s1 }
  0x25   : > { %p382_p4 = scmp.ne.s32.totalorder %s380_s18, %s381_s27  ;;  %p387_p8 = scmp.lt.s32.totalorder %s385_s29, %s381_s27 }
  0x27   : > { %p383_p5 = pnand %p382_p4, %p510_p9  ;;  %p388_p10 = por %p387_p8, %p386_p7 }
  0x29   : > { %p384_p6 = pneg %p383_p5 }
  0x2b   : > { %p389_p13 = pnand %p388_p10, %p384_p6 }
  0x2d   : > { %392 = shalt.err (!%p389_p13)
}
  0x2e   : > { %275 = dma.vmem_to_hbm [thread:$0]  (%p510_p9), %s175_s24, 32, %s177_s25, %s160_s26  }
  0x2f PF: > { %s188_s3 = sand.u32 1, %s427_s6   ;;  %p282_p0 = pnand %p263_p12, %p517_p11 }
  0x30   : > { %s189_s4 = scalar_lea.sflag [#allocation4], %s188_s3 }
  0x31   : > { %p283_p1 = pneg %p282_p0 }
  0x33   : > { %422 = dma.done.wait (%p283_p1), %s189_s4, 32  }
  0x34   : > { %424 = vsyncadd (%p283_p1), %s189_s4, 4294967264  ;;  %s17_s11 = sadd.s32 1, %s447_s11   ;;  %s585_s6 = smov %s431_s7 }
  0x35   : > { %p14_p2 = scmp.ge.s32.totalorder %s17_s11, 4   ;;  %s586_s7 = smov %s435_s8 }
  0x36   : > { %s587_s8 = smov %s515_s20  ;;  %s588_s9 = smov %s443_s10 }
  0x37   : > { %s589_s10 = smov %s591_s14  ;;  %16 = sbr.rel (!%p14_p2) target bundleno = 6 (0x6), region = 69 }
  0x3c   :  { %195 = vsyncpa [#allocation3], 1 }
  0x3d   :  { %197 = vsyncpa [#allocation3 + $0x1], 1 }
  0x3e   :  { %198 = vsyncpa [#allocation4], 1 }
  0x3f   :  { %200 = vsyncpa [#allocation4 + $0x1], 1 }

</bundles_post_ra>
